<compile_context>
chip_gen: v6e
topology: v6e:2x2x1
jax: 0.10.0
libtpu: 0.0.40
codegen_flags: <defaults>
</compile_context>

<pallas_src>
import jax
import jax.numpy as jnp
from jax.experimental import pallas as pl
from jax.experimental.pallas import tpu as pltpu


def _round_up(x, m):
    return (x + m - 1) // m * m


# ---------------------------------------------------------------------------
# Kernel
# ---------------------------------------------------------------------------
def ffn_kernel(x_ref, w1_ref, b1_ref, w2_ref, b2_ref, w3_ref, b3_ref,
               o_ref, acc_ref):
    # x:  (tb, d_p)  f32   (cast to bf16 in-kernel)
    # w1: (d_p, th)  bf16   b1: (1, th)  f32
    # w2: (th, d_p)  bf16   b2: (1, d_p) f32
    # w3: (d_p, c_p) bf16   b3: (1, c_p) f32
    # o:  (tb, c_p)  out_dtype (lane-dense, c_p % 128 == 0)
    # acc:(tb, d_p)  f32 scratch -- linear2 partial sums over hidden tiles
    j = pl.program_id(1)

    @pl.when(j == 0)
    def _init():
        acc_ref[...] = jnp.zeros_like(acc_ref)

    # bf16 MXU inputs, f32 accumulation.
    x = x_ref[...].astype(jnp.bfloat16)

    h1 = jnp.dot(x, w1_ref[...], preferred_element_type=jnp.float32) + b1_ref[...]
    h1 = jnp.maximum(h1, 0.0).astype(jnp.bfloat16)

    acc_ref[...] += jnp.dot(h1, w2_ref[...], preferred_element_type=jnp.float32)

    @pl.when(j == pl.num_programs(1) - 1)
    def _finalize():
        h2 = jnp.maximum(acc_ref[...] + b2_ref[...], 0.0).astype(jnp.bfloat16)
        out = jnp.dot(h2, w3_ref[...], preferred_element_type=jnp.float32) + b3_ref[...]
        o_ref[...] = out.astype(o_ref.dtype)


# ---------------------------------------------------------------------------
# VMEM / tile selection helpers
# ---------------------------------------------------------------------------
def _vmem_capacity_bytes():
    try:
        return int(pltpu.get_tpu_info().vmem_capacity_bytes)
    except Exception:
        return 64 * 1024 * 1024  # v7x per-TC capacity: safe lower bound


def _tensorcores_per_chip():
    try:
        if "v7" in jax.devices()[0].device_kind.lower():
            return 2
    except Exception:
        pass
    return 1


def _vmem_footprint(tb, th, d_p, c_p, out_itemsize):
    """Conservative per-invocation VMEM bytes (BlockSpecs double-buffered)."""
    f32, bf16 = 4, 2
    n = 0
    n += 2 * tb * d_p * f32             # x batch tile (f32 in HBM)
    n += 2 * d_p * th * bf16            # w1 column tile
    n += 2 * 8 * th * f32               # b1 tile (sublane padded)
    n += 2 * th * d_p * bf16            # w2 row tile
    n += 2 * 8 * d_p * f32              # b2
    n += 2 * d_p * c_p * bf16           # w3 (constant index, still 2 buffers)
    n += 2 * 8 * c_p * f32              # b3
    n += 2 * tb * c_p * out_itemsize    # output tile
    n += tb * d_p * f32                 # f32 accumulator scratch
    # transient intermediates: h1 (f32 + bf16), x bf16, h2 bf16, out f32
    n += tb * th * (f32 + bf16) + tb * d_p * (f32 + 2 * bf16) + tb * c_p * f32
    return n


def _select_tiles(b, d_p, h_p, c_p, out_itemsize, *, tb=None, th=None):
    vmem_cap = _vmem_capacity_bytes()
    budget = int(vmem_cap * 0.7)          # headroom for compiler scratch

    b8 = _round_up(max(b, 1), 8)
    if tb is not None:
        tb_cands = [min(_round_up(tb, 8), b8)]
    else:
        # Fill the 256-wide MXU M dim (v6e/v7x) when the batch allows it;
        # tiny batches use the (8-aligned) batch itself to avoid padding waste.
        tb_cands = [t for t in (512, 256, 128) if t <= b8] or [b8]

    if th is not None:
        assert th % 128 == 0 and h_p % th == 0, (
            "th must be a 128-multiple divisor of the padded hidden dim")
        th_cands = [th]
    else:
        th_cands = [t for t in range(h_p, 0, -128) if h_p % t == 0]

    tb_sel, th_sel = tb_cands[-1], th_cands[-1]
    found = False
    for t_b in tb_cands:
        for t_h in th_cands:
            if _vmem_footprint(t_b, t_h, d_p, c_p, out_itemsize) <= budget:
                tb_sel, th_sel = t_b, t_h
                found = True
                break
        if found:
            break

    # v7x: 2 TensorCores/chip -- make sure the "parallel" batch axis has at
    # least 2 steps when the batch is big enough to split.
    if tb is None and _tensorcores_per_chip() >= 2 and 256 <= b8 < 2 * tb_sel:
        tb_sel = max(128, tb_sel // 2)

    footprint = _vmem_footprint(tb_sel, th_sel, d_p, c_p, out_itemsize)
    vmem_limit = min(int(vmem_cap * 0.85), max(footprint + (8 << 20), 32 << 20))
    return tb_sel, th_sel, vmem_limit


# ---------------------------------------------------------------------------
# Parameter preparation (pad + cast ONCE) and the forward wrapper
# ---------------------------------------------------------------------------
def prepare_params(w1, b1, w2, b2, w3, b3):
    """Weights are (in, out); biases (out,) or (1, out).  Pads every dim to a
    multiple of 128 and casts weights to bf16 (biases stay f32) a single time.
    Zero padding keeps the padded math exact."""
    d, h = w1.shape
    c = w3.shape[1]
    d_p, h_p, c_p = _round_up(d, 128), _round_up(h, 128), _round_up(c, 128)
    bf16 = jnp.bfloat16

    def pad_b(b_arr, n, n_p):
        return jnp.pad(b_arr.astype(jnp.float32).reshape(1, -1), ((0, 0), (0, n_p - n)))

    prepared = (
        jnp.pad(w1.astype(bf16), ((0, d_p - d), (0, h_p - h))),
        pad_b(b1, h, h_p),
        jnp.pad(w2.astype(bf16), ((0, h_p - h), (0, d_p - d))),
        pad_b(b2, d, d_p),
        jnp.pad(w3.astype(bf16), ((0, d_p - d), (0, c_p - c))),
        pad_b(b3, c, c_p),
    )
    dims = dict(d=d, h=h, c=c, d_p=d_p, h_p=h_p, c_p=c_p)
    return prepared, dims


def feedforward(x, prepared, dims, *, out_dtype=jnp.float32, tb=None, th=None):
    """x: (b, d) float32.  prepared/dims come from prepare_params."""
    b, d = x.shape
    assert d == dims["d"], f"inputs.shape = {x.shape} must be (b, {dims['d']})"
    d_p, h_p, c_p = dims["d_p"], dims["h_p"], dims["c_p"]

    tb, th, vmem_limit = _select_tiles(
        b, d_p, h_p, c_p, jnp.dtype(out_dtype).itemsize, tb=tb, th=th)
    b_p = _round_up(b, tb)

    # x stays f32 (bf16 cast happens in-kernel); pad only when needed.
    if (b_p, d_p) != (b, d):
        x = jnp.pad(x, ((0, b_p - b), (0, d_p - d)))

    w1_p, b1_p, w2_p, b2_p, w3_p, b3_p = prepared

    out_p = pl.pallas_call(
        ffn_kernel,
        out_shape=jax.ShapeDtypeStruct((b_p, c_p), out_dtype),
        grid_spec=pltpu.PrefetchScalarGridSpec(
            num_scalar_prefetch=0,
            grid=(b_p // tb, h_p // th),
            in_specs=[
                pl.BlockSpec((tb, d_p), lambda i, j: (i, 0)),   # x batch tile
                pl.BlockSpec((d_p, th), lambda i, j: (0, j)),   # w1 column tile
                pl.BlockSpec((1, th), lambda i, j: (0, j)),     # b1 tile
                pl.BlockSpec((th, d_p), lambda i, j: (j, 0)),   # w2 row tile
                pl.BlockSpec((1, d_p), lambda i, j: (0, 0)),    # b2 (resident)
                pl.BlockSpec((d_p, c_p), lambda i, j: (0, 0)),  # w3 (resident)
                pl.BlockSpec((1, c_p), lambda i, j: (0, 0)),    # b3 (resident)
            ],
            out_specs=pl.BlockSpec((tb, c_p), lambda i, j: (i, 0)),
            scratch_shapes=[pltpu.VMEM((tb, d_p), jnp.float32)],
        ),
        compiler_params=pltpu.CompilerParams(
            dimension_semantics=("parallel", "arbitrary"),
            vmem_limit_bytes=vmem_limit,
        ),
    )(x, w1_p, b1_p, w2_p, b2_p, w3_p, b3_p)

    return out_p[:b, :dims["c"]]


# ---------------------------------------------------------------------------
# Init + reference + test
# ---------------------------------------------------------------------------
def init_params(key, num_features, num_classes):
    """PyTorch-Linear-style init U(-1/sqrt(fan_in), +1/sqrt(fan_in)); weights
    returned already transposed to (in, out)."""
    d, c = num_features, num_classes
    ks = jax.random.split(key, 6)

    def lin(kw, kb, fan_in, fan_out):
        bound = 1.0 / jnp.sqrt(float(fan_in))
        w = jax.random.uniform(kw, (fan_in, fan_out), jnp.float32, -bound, bound)
        b = jax.random.uniform(kb, (1, fan_out), jnp.float32, -bound, bound)
        return w, b

    w1, b1 = lin(ks[0], ks[1], d, 4 * d)
    w2, b2 = lin(ks[2], ks[3], 4 * d, d)
    w3, b3 = lin(ks[4], ks[5], d, c)
    return w1, b1, w2, b2, w3, b3


def reference(x, w1, b1, w2, b2, w3, b3):
    """Same bf16-input / f32-accumulate numerics as the kernel."""
    bf = lambda a: a.astype(jnp.bfloat16)
    h = jnp.maximum(jnp.dot(bf(x), bf(w1), preferred_element_type=jnp.float32) + b1, 0.0)
    h = jnp.maximum(jnp.dot(bf(h), bf(w2), preferred_element_type=jnp.float32) + b2, 0.0)
    return jnp.dot(bf(h), bf(w3), preferred_element_type=jnp.float32) + b3


if __name__ == "__main__":
    key = jax.random.PRNGKey(0)

    # --- case 1: DDP-demo shape (d=32 -> hidden 128, c=16, batch 8) --------
    num_features, num_classes, batch = 32, 16, 8
    k_x, k_p, key = jax.random.split(key, 3)
    x = jax.random.normal(k_x, (batch, num_features), jnp.float32)
    params = init_params(k_p, num_features, num_classes)
    prepared, dims = prepare_params(*params)

    out = jax.block_until_ready(feedforward(x, prepared, dims))
    assert out.shape == (batch, num_classes)
    ref = reference(x, *params)
    assert jnp.allclose(out, ref, atol=1e-2, rtol=1e-2), \
        float(jnp.max(jnp.abs(out - ref)))

    # --- case 2: force the streamed hidden-dim path (grid = (3, 2)) --------
    nf2, nc2, batch2 = 64, 16, 24
    k_x2, k_p2, key = jax.random.split(key, 3)
    x2 = jax.random.normal(k_x2, (batch2, nf2), jnp.float32)
    params2 = init_params(k_p2, nf2, nc2)
    prepared2, dims2 = prepare_params(*params2)

    out2 = jax.block_until_ready(feedforward(x2, prepared2, dims2, tb=8, th=128))
    assert out2.shape == (batch2, nc2)
    ref2 = reference(x2, *params2)
    assert jnp.allclose(out2, ref2, atol=1e-2, rtol=1e-2), \
        float(jnp.max(jnp.abs(out2 - ref2)))

    print("KERNEL_OK")
</pallas_src>

<mosaic_0001>
module attributes {stable_mosaic.version = 11 : i64} {
  func.func @ffn_kernel(%arg0: i32, %arg1: i32, %arg2: memref<8x128xf32, #tpu.memory_space<vmem>>, %arg3: memref<128x128xbf16, #tpu.memory_space<vmem>>, %arg4: memref<1x128xf32, #tpu.memory_space<vmem>>, %arg5: memref<128x128xbf16, #tpu.memory_space<vmem>>, %arg6: memref<1x128xf32, #tpu.memory_space<vmem>>, %arg7: memref<128x128xbf16, #tpu.memory_space<vmem>>, %arg8: memref<1x128xf32, #tpu.memory_space<vmem>>, %arg9: memref<8x128xf32, #tpu.memory_space<vmem>>, %arg10: memref<8x128xf32, #tpu.memory_space<vmem>>) attributes {dimension_semantics = [#tpu.dimension_semantics<parallel>, #tpu.dimension_semantics<arbitrary>], iteration_bounds = array<i64: 1, 1>, scalar_prefetch = 0 : i64, scratch_operands = 1 : i64, tpu.core_type = #tpu.core_type<tc>, window_params = [{transform_indices = @transform_0, window_bounds = array<i64: 8, 128>}, {transform_indices = @transform_1, window_bounds = array<i64: 128, 128>}, {transform_indices = @transform_2, window_bounds = array<i64: 1, 128>}, {transform_indices = @transform_3, window_bounds = array<i64: 128, 128>}, {pipeline_mode = #tpu.pipeline_mode<synchronous>, transform_indices = @transform_4, window_bounds = array<i64: 1, 128>}, {pipeline_mode = #tpu.pipeline_mode<synchronous>, transform_indices = @transform_5, window_bounds = array<i64: 128, 128>}, {pipeline_mode = #tpu.pipeline_mode<synchronous>, transform_indices = @transform_6, window_bounds = array<i64: 1, 128>}, {transform_indices = @transform_7, window_bounds = array<i64: 8, 128>}]} {
    %c0_i32 = arith.constant 0 : i32
    %0 = arith.cmpi eq, %arg1, %c0_i32 : i32
    %1 = arith.extui %0 : i1 to i32
    %c0_i32_0 = arith.constant 0 : i32
    %2 = arith.cmpi ne, %1, %c0_i32_0 : i32
    scf.if %2 {
      %cst_16 = arith.constant 0.000000e+00 : f32
      %21 = vector.broadcast %cst_16 : f32 to vector<8x128xf32>
      %c0_17 = arith.constant 0 : index
      %c0_18 = arith.constant 0 : index
      %22 = vector.load %arg10[%c0_17, %c0_18] : memref<8x128xf32, #tpu.memory_space<vmem>>, vector<8x128xf32>
      tpu.vector_store %arg10[%c0_17, %c0_18], %21 {strides = array<i32>} : memref<8x128xf32, #tpu.memory_space<vmem>>, vector<8x128xf32>,
    } else {
    }
    %c0 = arith.constant 0 : index
    %c0_1 = arith.constant 0 : index
    %3 = vector.load %arg2[%c0, %c0_1] : memref<8x128xf32, #tpu.memory_space<vmem>>, vector<8x128xf32>
    %4 = arith.truncf %3 : vector<8x128xf32> to vector<8x128xbf16>
    %c0_2 = arith.constant 0 : index
    %c0_3 = arith.constant 0 : index
    %5 = vector.load %arg3[%c0_2, %c0_3] : memref<128x128xbf16, #tpu.memory_space<vmem>>, vector<128x128xbf16>
    %cst = arith.constant dense<0.000000e+00> : vector<8x128xf32>
    %6 = tpu.matmul %4, %5, %cst {dimension_numbers = #tpu.dot_dimension_numbers<[1], [0], [0], [1], [0, 0, 1, 1], [], []>} : vector<8x128xbf16>, vector<128x128xbf16>, vector<8x128xf32> -> vector<8x128xf32>
    %c0_4 = arith.constant 0 : index
    %c0_5 = arith.constant 0 : index
    %7 = vector.load %arg4[%c0_4, %c0_5] : memref<1x128xf32, #tpu.memory_space<vmem>>, vector<1x128xf32>
    %8 = vector.broadcast %7 : vector<1x128xf32> to vector<8x128xf32>
    %9 = arith.addf %6, %8 : vector<8x128xf32>
    %cst_6 = arith.constant 0.000000e+00 : f32
    %10 = vector.broadcast %cst_6 : f32 to vector<8x128xf32>
    %11 = arith.maximumf %9, %10 : vector<8x128xf32>
    %12 = arith.truncf %11 : vector<8x128xf32> to vector<8x128xbf16>
    %c0_7 = arith.constant 0 : index
    %c0_8 = arith.constant 0 : index
    %13 = vector.load %arg10[%c0_7, %c0_8] : memref<8x128xf32, #tpu.memory_space<vmem>>, vector<8x128xf32>
    %c0_9 = arith.constant 0 : index
    %c0_10 = arith.constant 0 : index
    %14 = vector.load %arg5[%c0_9, %c0_10] : memref<128x128xbf16, #tpu.memory_space<vmem>>, vector<128x128xbf16>
    %cst_11 = arith.constant dense<0.000000e+00> : vector<8x128xf32>
    %15 = tpu.matmul %12, %14, %cst_11 {dimension_numbers = #tpu.dot_dimension_numbers<[1], [0], [0], [1], [0, 0, 1, 1], [], []>} : vector<8x128xbf16>, vector<128x128xbf16>, vector<8x128xf32> -> vector<8x128xf32>
    %16 = arith.addf %13, %15 : vector<8x128xf32>
    %c0_12 = arith.constant 0 : index
    %c0_13 = arith.constant 0 : index
    %17 = vector.load %arg10[%c0_12, %c0_13] : memref<8x128xf32, #tpu.memory_space<vmem>>, vector<8x128xf32>
    tpu.vector_store %arg10[%c0_12, %c0_13], %16 {strides = array<i32>} : memref<8x128xf32, #tpu.memory_space<vmem>>, vector<8x128xf32>,
    %c0_i32_14 = arith.constant 0 : i32
    %18 = arith.cmpi eq, %arg1, %c0_i32_14 : i32
    %19 = arith.extui %18 : i1 to i32
    %c0_i32_15 = arith.constant 0 : i32
    %20 = arith.cmpi ne, %19, %c0_i32_15 : i32
    scf.if %20 {
      %c0_16 = arith.constant 0 : index
      %c0_17 = arith.constant 0 : index
      %21 = vector.load %arg10[%c0_16, %c0_17] : memref<8x128xf32, #tpu.memory_space<vmem>>, vector<8x128xf32>
      %c0_18 = arith.constant 0 : index
      %c0_19 = arith.constant 0 : index
      %22 = vector.load %arg6[%c0_18, %c0_19] : memref<1x128xf32, #tpu.memory_space<vmem>>, vector<1x128xf32>
      %23 = vector.broadcast %22 : vector<1x128xf32> to vector<8x128xf32>
      %24 = arith.addf %21, %23 : vector<8x128xf32>
      %cst_20 = arith.constant 0.000000e+00 : f32
      %25 = vector.broadcast %cst_20 : f32 to vector<8x128xf32>
      %26 = arith.maximumf %24, %25 : vector<8x128xf32>
      %27 = arith.truncf %26 : vector<8x128xf32> to vector<8x128xbf16>
      %c0_21 = arith.constant 0 : index
      %c0_22 = arith.constant 0 : index
      %28 = vector.load %arg7[%c0_21, %c0_22] : memref<128x128xbf16, #tpu.memory_space<vmem>>, vector<128x128xbf16>
      %cst_23 = arith.constant dense<0.000000e+00> : vector<8x128xf32>
      %29 = tpu.matmul %27, %28, %cst_23 {dimension_numbers = #tpu.dot_dimension_numbers<[1], [0], [0], [1], [0, 0, 1, 1], [], []>} : vector<8x128xbf16>, vector<128x128xbf16>, vector<8x128xf32> -> vector<8x128xf32>
      %c0_24 = arith.constant 0 : index
      %c0_25 = arith.constant 0 : index
      %30 = vector.load %arg8[%c0_24, %c0_25] : memref<1x128xf32, #tpu.memory_space<vmem>>, vector<1x128xf32>
      %31 = vector.broadcast %30 : vector<1x128xf32> to vector<8x128xf32>
      %32 = arith.addf %29, %31 : vector<8x128xf32>
      %c0_26 = arith.constant 0 : index
      %c0_27 = arith.constant 0 : index
      %33 = vector.load %arg9[%c0_26, %c0_27] : memref<8x128xf32, #tpu.memory_space<vmem>>, vector<8x128xf32>
      tpu.vector_store %arg9[%c0_26, %c0_27], %32 {strides = array<i32>} : memref<8x128xf32, #tpu.memory_space<vmem>>, vector<8x128xf32>,
    } else {
    }
    return
  }
  func.func @transform_0(%arg0: i32, %arg1: i32) -> (i32, i32) {
    %c0_i32 = arith.constant 0 : i32
    %c0_i32_0 = arith.constant 0 : i32
    return %arg0, %c0_i32 : i32, i32
  }
  func.func @transform_1(%arg0: i32, %arg1: i32) -> (i32, i32) {
    %c0_i32 = arith.constant 0 : i32
    %c0_i32_0 = arith.constant 0 : i32
    return %c0_i32, %arg1 : i32, i32
  }
  func.func @transform_2(%arg0: i32, %arg1: i32) -> (i32, i32) {
    %c0_i32 = arith.constant 0 : i32
    %c0_i32_0 = arith.constant 0 : i32
    return %c0_i32, %arg1 : i32, i32
  }
  func.func @transform_3(%arg0: i32, %arg1: i32) -> (i32, i32) {
    %c0_i32 = arith.constant 0 : i32
    %c0_i32_0 = arith.constant 0 : i32
    return %arg1, %c0_i32 : i32, i32
  }
  func.func @transform_4(%arg0: i32, %arg1: i32) -> (i32, i32) {
    %c0_i32 = arith.constant 0 : i32
    %c0_i32_0 = arith.constant 0 : i32
    %c0_i32_1 = arith.constant 0 : i32
    return %c0_i32, %c0_i32_0 : i32, i32
  }
  func.func @transform_5(%arg0: i32, %arg1: i32) -> (i32, i32) {
    %c0_i32 = arith.constant 0 : i32
    %c0_i32_0 = arith.constant 0 : i32
    %c0_i32_1 = arith.constant 0 : i32
    return %c0_i32, %c0_i32_0 : i32, i32
  }
  func.func @transform_6(%arg0: i32, %arg1: i32) -> (i32, i32) {
    %c0_i32 = arith.constant 0 : i32
    %c0_i32_0 = arith.constant 0 : i32
    %c0_i32_1 = arith.constant 0 : i32
    return %c0_i32, %c0_i32_0 : i32, i32
  }
  func.func @transform_7(%arg0: i32, %arg1: i32) -> (i32, i32) {
    %c0_i32 = arith.constant 0 : i32
    %c0_i32_0 = arith.constant 0 : i32
    return %arg0, %c0_i32 : i32, i32
  }
}

</mosaic_0001>

<bundles_post_ra>
// kernel: tpu_custom_call.1
= control target key start
LH: loop header
LB: loop body
LE: loop exit
PB: predicated region body
PF: predicated region fallthrough
CT: control target
= control target key end

     0   :  { %12 = vsyncpa [#allocation4], 0  ;;  %s818_s0 = inlined_call_operand.hbm [shape: f32[8,128], index: 0, kind: input, shape index: {}]   ;;  %s819_s1 = inlined_call_operand.hbm [shape: bf16[128,128], index: 1, kind: input, shape index: {}]   ;;  %s820_s2 = inlined_call_operand.vmem [shape: f32[1,128], index: 2, kind: input, shape index: {}]   ;;  %s821_s3 = inlined_call_operand.hbm [shape: bf16[128,128], index: 3, kind: input, shape index: {}]   ;;  %s822_s4 = inlined_call_operand.vmem [shape: f32[1,128], index: 4, kind: input, shape index: {}]   ;;  %s823_s5 = inlined_call_operand.hbm [shape: bf16[128,128], index: 5, kind: input, shape index: {}]   ;;  %s824_s6 = inlined_call_operand.vmem [shape: f32[1,128], index: 6, kind: input, shape index: {}]   ;;  %s825_s7 = inlined_call_operand.hbm [shape: f32[8,128], index: 7, kind: output, shape index: {}]  }
   0x1   :  { %13 = vsyncpa [#allocation7], 0 }
   0x2   :  { %14 = vsyncpa [#allocation10], 0 }
   0x3   :  { %15 = vsyncpa [#allocation5], 0  ;;  %s706_s24 = smov [#allocation6]  }
   0x4   :  { %s31_s25 = sshll.u32 %s706_s24, 4  ;;  %s32_s25 = int_to_ptr.vmem [resolvable:$true] %s31_s25 }
   0x5   :  { %s606_s26 = scalar_lea.vmem %s32_s25, 1024  ;;  %p611_p1 = scmp.lt.s32.totalorder %s32_s25, %s32_s25 }
   0x6   :  { %p607_p0 = scmp.ne.s32.totalorder %s32_s25, %s606_s26  ;;  %p612_p2 = scmp.lt.s32.totalorder %s606_s26, %s606_s26 }
   0x8   :  { %p613_p3 = por %p612_p2, %p611_p1 }
   0xa   :  { %p614_p4 = pnand %p613_p3, %p607_p0 }
   0xc   :  { %617 = shalt.err (!%p614_p4)
}
   0xd   :  { %s707_s27 = smov 64   ;;  %s708_s28 = smov 4  }
   0xe   :  { %37 = dma.hbm_to_vmem [thread:$0]  %s819_s1, 1024, %s32_s25, [#allocation7], %s707_s27, %s707_s27, %s708_s28  }
   0xf   :  { %s709_s8 = smov [#allocation3]   ;;  %s710_s10 = smov [#allocation8]  }
  0x10   :  { %s22_s9 = sshll.u32 %s709_s8, 4  ;;  %s45_s11 = sshll.u32 %s710_s10, 4  ;;  %s23_s9 = int_to_ptr.vmem [resolvable:$true] %s22_s9  ;;  %s46_s11 = int_to_ptr.vmem [resolvable:$true] %s45_s11 }
  0x11   :  { %s626_s12 = scalar_lea.vmem %s23_s9, 128  ;;  %p631_p6 = scmp.lt.s32.totalorder %s23_s9, %s23_s9 }
  0x12   :  { %p627_p5 = scmp.ne.s32.totalorder %s23_s9, %s626_s12  ;;  %p632_p7 = scmp.lt.s32.totalorder %s626_s12, %s626_s12 }
  0x14   :  { %p633_p8 = por %p632_p7, %p631_p6 }
  0x16   :  { %p634_p9 = pnand %p633_p8, %p627_p5 }
  0x18   :  { %637 = shalt.err (!%p634_p9)
}
  0x19   :  { %25 = dma.hbm_to_vmem [thread:$0]  %s818_s0, 128, %s23_s9, [#allocation4]  }
  0x1a   :  { %s646_s15 = scalar_lea.vmem %s46_s11, 1024  ;;  %p651_p11 = scmp.lt.s32.totalorder %s46_s11, %s46_s11 }
  0x1b   :  { %p647_p10 = scmp.ne.s32.totalorder %s46_s11, %s646_s15  ;;  %p652_p12 = scmp.lt.s32.totalorder %s646_s15, %s646_s15 }
  0x1d   :  { %p653_p13 = por %p652_p12, %p651_p11 }
  0x1f   :  { %p654_p0 = pnand %p653_p13, %p647_p10 }
  0x21   :  { %657 = shalt.err (!%p654_p0)
}
  0x22   :  { %51 = dma.hbm_to_vmem [thread:$0]  %s821_s3, 1024, %s46_s11, [#allocation7], %s707_s27, %s707_s27, %s708_s28  }
  0x23   :  { %s711_s17 = smov [#allocation9]  }
  0x24   :  { %s59_s18 = sshll.u32 %s711_s17, 4  ;;  %s60_s18 = int_to_ptr.vmem [resolvable:$true] %s59_s18 }
  0x25   :  { %s666_s19 = scalar_lea.vmem %s60_s18, 1024  ;;  %p671_p2 = scmp.lt.s32.totalorder %s60_s18, %s60_s18 }
  0x26   :  { %p667_p1 = scmp.ne.s32.totalorder %s60_s18, %s666_s19  ;;  %p672_p3 = scmp.lt.s32.totalorder %s666_s19, %s666_s19 }
  0x28   :  { %p673_p4 = por %p672_p3, %p671_p2 }
  0x2a   :  { %p674_p5 = pnand %p673_p4, %p667_p1 }
  0x2c   :  { %677 = shalt.err (!%p674_p5)
}
  0x2d   :  { %65 = dma.hbm_to_vmem [thread:$0]  %s823_s5, 1024, %s60_s18, [#allocation10], %s707_s27, %s707_s27, %s708_s28  }
  0x2e   :  { %698 = dma.done.wait [#allocation4], 128  }
  0x2f   :  { %699 = vsyncadd [#allocation4], 4294967168 }
  0x30   :  { %700 = dma.done.wait [#allocation7], 2048  }
  0x31   :  { %701 = vsyncadd [#allocation7], 4294965248 }
  0x32   :  { %702 = dma.done.wait [#allocation10], 1024  }
  0x33   :  { %703 = vsyncadd [#allocation10], 4294966272  ;;  %v712_v0 = vmov 0.0   ;;  %vm713_vm0 = vmmov 0   ;;  %v574_v1 = vld [vmem:[#allocation6 + $0x38] sm:$0xff]   ;;  %v575_v2 = vld [vmem:[#allocation6 + $0x30] sm:$0xff]  }
  0x34   :  { %505 = vmatprep.subr.bf16.mxu0 %v712_v0  ;;  %521 = vmatprep.mubr.msk.bf16.mxu0 %vm713_vm0, %v712_v0  ;;  %v576_v3 = vld [vmem:[#allocation6 + $0x28] sm:$0xff]   ;;  %v582_v4 = vld [vmem:[#allocation8 + $0x38] sm:$0xff]   ;;  %v577_v5 = vld [vmem:[#allocation6 + $0x20] sm:$0xff]   ;;  %s714_s24 = smov [#allocation11]  }
  0x35   :  { %525 = vmatprep.subr.bf16.mxu1 %v712_v0  ;;  %541 = vmatprep.mubr.msk.bf16.mxu1 %vm713_vm0, %v712_v0  ;;  %v583_v6 = vld [vmem:[#allocation8 + $0x30] sm:$0xff]   ;;  %v578_v7 = vld [vmem:[#allocation6 + $0x18] sm:$0xff]   ;;  %v584_v8 = vld [vmem:[#allocation8 + $0x28] sm:$0xff]   ;;  %s440_s25 = sshll.u32 %s714_s24, 4  ;;  %s441_s25 = int_to_ptr.vmem [resolvable:$true] %s440_s25 }
  0x36   :  { %506 = vmatpush3.bf16.msra.mxu0 %v574_v1  ;;  %526 = vmatpush3.bf16.msra.mxu1 %v582_v4  ;;  %v579_v9 = vld [vmem:[#allocation6 + $0x10] sm:$0xff]   ;;  %v585_v10 = vld [vmem:[#allocation8 + $0x20] sm:$0xff]   ;;  %v580_v11 = vld [vmem:[#allocation6 + $0x8] sm:$0xff]   ;;  %p683_p7 = scmp.lt.s32.totalorder %s441_s25, %s441_s25 }
  0x37   :  { %507 = vmatprep.subr.bf16.mxu0 %v712_v0  ;;  %527 = vmatprep.subr.bf16.mxu1 %v712_v0  ;;  %v586_v12 = vld [vmem:[#allocation8 + $0x18] sm:$0xff]   ;;  %v581_v13 = vld [vmem:[#allocation6] sm:$0xff]   ;;  %v587_v15 = vld [vmem:[#allocation8 + $0x10] sm:$0xff]  }
  0x38   :  { %v86_v14 = vld [vmem:[#allocation3] sm:$0xff]  ;;  %v588_v17 = vld [vmem:[#allocation8 + $0x8] sm:$0xff]   ;;  %v589_v18 = vld [vmem:[#allocation8] sm:$0xff]  }
  0x39   :  { %v87_v16 = vpack.c.bf16 %v86_v14, %v86_v14  ;;  %v590_v19 = vld [vmem:[#allocation9 + $0x38] sm:$0xff]   ;;  %v591_v20 = vld [vmem:[#allocation9 + $0x30] sm:$0xff]   ;;  %v592_v21 = vld [vmem:[#allocation9 + $0x28] sm:$0xff]  }
  0x3a   :  { %508 = vmatpush3.bf16.msra.mxu0 %v575_v2  ;;  %528 = vmatpush3.bf16.msra.mxu1 %v583_v6  ;;  %v593_v22 = vld [vmem:[#allocation9 + $0x20] sm:$0xff]   ;;  %v594_v23 = vld [vmem:[#allocation9 + $0x18] sm:$0xff]   ;;  %v595_v24 = vld [vmem:[#allocation9 + $0x10] sm:$0xff]  }
  0x3b   :  { %509 = vmatprep.subr.bf16.mxu0 %v712_v0  ;;  %529 = vmatprep.subr.bf16.mxu1 %v712_v0  ;;  %v451_v25 = vld [vmem:[%s820_s2] ss:$0 sm:$0xff]  ;;  %v596_v33 = vld [vmem:[#allocation9 + $0x8] sm:$0xff]   ;;  %v597_v34 = vld [vmem:[#allocation9] sm:$0xff]  }
  0x3c   :  { %v468_v35 = vld [vmem:[%s822_s4] ss:$0 sm:$0xff]  ;;  %s678_s4 = scalar_lea.vmem %s441_s25, 128 }
  0x3d   :  { %v469_v43 = vld [vmem:[%s824_s6] ss:$0 sm:$0xff]  ;;  %p679_p6 = scmp.ne.s32.totalorder %s441_s25, %s678_s4  ;;  %p684_p8 = scmp.lt.s32.totalorder %s678_s4, %s678_s4 }
  0x3e   :  { %510 = vmatpush3.bf16.msra.mxu0 %v576_v3  ;;  %530 = vmatpush3.bf16.msra.mxu1 %v584_v8 }
  0x3f   :  { %511 = vmatprep.subr.bf16.mxu0 %v712_v0  ;;  %531 = vmatprep.subr.bf16.mxu1 %v712_v0  ;;  %p685_p9 = por %p684_p8, %p683_p7 }
  0x41   :  { %p686_p10 = pnand %p685_p9, %p679_p6 }
  0x42   :  { %512 = vmatpush3.bf16.msra.mxu0 %v577_v5  ;;  %532 = vmatpush3.bf16.msra.mxu1 %v585_v10 }
  0x43   :  { %513 = vmatprep.subr.bf16.mxu0 %v712_v0  ;;  %533 = vmatprep.subr.bf16.mxu1 %v712_v0 }
  0x46   :  { %514 = vmatpush3.bf16.msra.mxu0 %v578_v7  ;;  %534 = vmatpush3.bf16.msra.mxu1 %v586_v12 }
  0x47   :  { %515 = vmatprep.subr.bf16.mxu0 %v712_v0  ;;  %535 = vmatprep.subr.bf16.mxu1 %v712_v0 }
  0x4a   :  { %516 = vmatpush3.bf16.msra.mxu0 %v579_v9  ;;  %536 = vmatpush3.bf16.msra.mxu1 %v587_v15 }
  0x4b   :  { %517 = vmatprep.subr.bf16.mxu0 %v712_v0  ;;  %537 = vmatprep.subr.bf16.mxu1 %v712_v0 }
  0x4e   :  { %518 = vmatpush3.bf16.msra.mxu0 %v580_v11  ;;  %538 = vmatpush3.bf16.msra.mxu1 %v588_v17 }
  0x4f   :  { %519 = vmatprep.subr.bf16.mxu0 %v712_v0  ;;  %539 = vmatprep.subr.bf16.mxu1 %v712_v0 }
  0x52   :  { %520 = vmatpush3.bf16.msra.mxu0 %v581_v13  ;;  %540 = vmatpush3.bf16.msra.mxu1 %v589_v18 }
  0x53   :  { %545 = vmatprep.subr.bf16.mxu0 %v712_v0 }
  0x55   :  { %522 = vmatmul.mubr.bf16.vlgmr.msra.gmra.mxu0 %v87_v16 }
  0x56   :  { %561 = vmatprep.mubr.msk.bf16.mxu0 %vm713_vm0, %v712_v0  ;;  %546 = vmatpush3.bf16.msra.mxu0 %v590_v19 }
  0x57   :  { %547 = vmatprep.subr.bf16.mxu0 %v712_v0 }
  0x5a   :  { %548 = vmatpush3.bf16.msra.mxu0 %v591_v20 }
  0x5b   :  { %549 = vmatprep.subr.bf16.mxu0 %v712_v0 }
  0x5e   :  { %550 = vmatpush3.bf16.msra.mxu0 %v592_v21 }
  0x5f   :  { %551 = vmatprep.subr.bf16.mxu0 %v712_v0 }
  0x62   :  { %552 = vmatpush3.bf16.msra.mxu0 %v593_v22 }
  0x63   :  { %553 = vmatprep.subr.bf16.mxu0 %v712_v0 }
  0x66   :  { %554 = vmatpush3.bf16.msra.mxu0 %v594_v23 }
  0x67   :  { %555 = vmatprep.subr.bf16.mxu0 %v712_v0 }
  0x6a   :  { %556 = vmatpush3.bf16.msra.mxu0 %v595_v24 }
  0x6b   :  { %557 = vmatprep.subr.bf16.mxu0 %v712_v0 }
  0x6e   :  { %558 = vmatpush3.bf16.msra.mxu0 %v596_v33 }
  0x6f   :  { %559 = vmatprep.subr.bf16.mxu0 %v712_v0 }
  0x72   :  { %560 = vmatpush3.bf16.msra.mxu0 %v597_v34 }
 0x115   :  { %v193_v26 = vpop.f32.mrf.mxu0 }
 0x116   :  { %v194_v27 = vadd.f32 %v451_v25, %v193_v26 }
 0x117   :  { %v523_v28 = vpop.f32.mrf.mxu0 }
 0x118   :  { %v199_v29 = vmax.f32 %v194_v27, 0.0 }
 0x119   :  { %v196_v30 = vpop.f32.mrf.mxu0 }
 0x11a   :  { %v200_v31 = vpack.c.bf16 %v199_v29, %v199_v29 }
 0x11b   :  { %v524_v32 = vpop.f32.mrf.mxu0 }
 0x11c   :  { %542 = vmatmul.mubr.bf16.vlgmr.msra.gmra.mxu1 %v200_v31 }
 0x1dc   :  { %v300_v36 = vpop.f32.mrf.mxu1 }
 0x1dd   :  { %v319_v37 = vadd.f32 %v468_v35, %v300_v36 }
 0x1de   :  { %v543_v38 = vpop.f32.mrf.mxu1 }
 0x1df   :  { %v320_v39 = vmax.f32 %v319_v37, 0.0 }
 0x1e0   :  { %v303_v40 = vpop.f32.mrf.mxu1 }
 0x1e1   :  { %v321_v41 = vpack.c.bf16 %v320_v39, %v320_v39 }
 0x1e2   :  { %v544_v42 = vpop.f32.mrf.mxu1 }
 0x1e3   :  { %562 = vmatmul.mubr.bf16.vlgmr.msra.gmra.mxu0 %v321_v41 }
 0x2a3   :  { %v427_v44 = vpop.f32.mrf.mxu0 }
 0x2a4   :  { %v428_v45 = vadd.f32 %v469_v43, %v427_v44 }
 0x2a5   :  { %v563_v46 = vpop.f32.mrf.mxu0 }
 0x2a6   :  { %433 = vst [vmem:[#allocation11] sm:$0xff] %v428_v45 }
 0x2a7   :  { %v430_v47 = vpop.f32.mrf.mxu0 }
 0x2a8   :  { %689 = shalt.err (!%p686_p10)
}
 0x2a9   :  { %443 = dma.vmem_to_hbm [thread:$0]  %s441_s25, 128, %s825_s7, [#allocation5]   ;;  %v564_v48 = vpop.f32.mrf.mxu0 }
 0x2aa   :  { %704 = dma.done.wait [#allocation5], 128  }
 0x2ab   :  { %705 = vsyncadd [#allocation5], 4294967168 }
 0x2ac   :  { %447 = vsyncpa [#allocation4], 1 }
 0x2ad   :  { %448 = vsyncpa [#allocation7], 1 }
 0x2ae   :  { %449 = vsyncpa [#allocation10], 1 }
 0x2af   :  { %450 = vsyncpa [#allocation5], 1 }

</bundles_post_ra>
